<compile_context>
chip_gen: v5e
topology: v5e:2x2
jax: 0.10.0
libtpu: 0.0.40
codegen_flags: <defaults>
</compile_context>

<pallas_src>
import jax
import jax.numpy as jnp
from jax.experimental import pallas as pl
from jax.experimental.pallas import tpu as pltpu


def _dma_copy_kernel(x_ref, o_ref, sem):
    # Pure HBM->HBM DMA: no VMEM staging, no vld/vst, no pipeline overhead.
    cp = pltpu.make_async_copy(x_ref, o_ref, sem)
    cp.start()
    cp.wait()


@jax.jit
def global_cnn_pallas_pass(x):
    """Single-DMA Pallas identity pass over x (any shape). Returns a copy of x."""
    if x.size == 0:  # degenerate input: nothing to copy
        return x

    return pl.pallas_call(
        _dma_copy_kernel,
        out_shape=jax.ShapeDtypeStruct(x.shape, x.dtype),
        in_specs=[pl.BlockSpec(memory_space=pl.ANY)],
        out_specs=pl.BlockSpec(memory_space=pl.ANY),
        scratch_shapes=[pltpu.SemaphoreType.DMA(())],
    )(x)


def global_cnn_forward(x):
    """Exact semantics of global_cnn.forward: reads x.shape, returns None.

    The reference `_forward_impl` performs no tensor compute and has no return
    statement, so no kernel is launched here (launching one would be dead work
    whose result is discarded).
    """
    b, c, h, w = x.shape  # mirrors `_forward_impl`
    del b, c, h, w
    return None


if __name__ == "__main__":
    key = jax.random.PRNGKey(0)
    # Small NCHW input consistent with the module's 4-D shape unpack.
    x = jax.random.normal(key, (2, 4, 16, 16), dtype=jnp.float32)

    # Run the Pallas kernel once and block on the result.
    y = global_cnn_pallas_pass(x)
    y = jax.block_until_ready(y)

    # Kernel correctness: identity pass over x.
    assert y.shape == x.shape and y.dtype == x.dtype
    assert bool(jnp.all(y == x))

    # Module-level forward semantics: returns None, exactly as PyTorch.
    out = global_cnn_forward(x)
    assert out is None

    print("KERNEL_OK")
</pallas_src>

<mosaic_0001>
module attributes {stable_mosaic.version = 11 : i64} {
  func.func @_dma_copy_kernel(%arg0: memref<2x4x16x16xf32, #tpu.memory_space<any>>, %arg1: memref<2x4x16x16xf32, #tpu.memory_space<any>>, %arg2: memref<!tpu.dma_semaphore, #tpu.memory_space<semaphore_mem>>) attributes {dimension_semantics = [], scalar_prefetch = 0 : i64, scratch_operands = 1 : i64, tpu.core_type = #tpu.core_type<tc>} {
    tpu.enqueue_dma source(%arg0 : memref<2x4x16x16xf32, #tpu.memory_space<any>>) target(%arg1 : memref<2x4x16x16xf32, #tpu.memory_space<any>>) target_semaphore(%arg2 : memref<!tpu.dma_semaphore, #tpu.memory_space<semaphore_mem>>)
    tpu.wait_dma2 semaphore(%arg2 : memref<!tpu.dma_semaphore, #tpu.memory_space<semaphore_mem>>) src(%arg0 : memref<2x4x16x16xf32, #tpu.memory_space<any>>) dst(%arg1 : memref<2x4x16x16xf32, #tpu.memory_space<any>>)
    return
  }
}

</mosaic_0001>

<bundles_post_ra>
// kernel: global_cnn_pallas_pass.1
= control target key start
LH: loop header
LB: loop body
LE: loop exit
PB: predicated region body
PF: predicated region fallthrough
CT: control target
= control target key end

     0   :  { %s34_s12 = smov [#allocation2]   ;;  %s35_s13 = smov [#allocation3]   ;;  %s53_s0 = inlined_call_operand.hbm [shape: f32[2,4,16,16], index: 0, kind: input, shape index: {}]   ;;  %s54_s1 = inlined_call_operand.hbm [shape: f32[2,4,16,16], index: 1, kind: output, shape index: {}]  }
   0x1   :  { %s10_s8 = sshll.u32 %s53_s0, 4  ;;  %s12_s11 = sshll.u32 %s54_s1, 4  ;;  %s11_s8 = int_to_ptr.hbm [resolvable:$true] %s10_s8  ;;  %s13_s11 = int_to_ptr.hbm [resolvable:$true] %s12_s11 }
   0x2   :  { %s36_s14 = smov 0  }
   0x3   :  { %16 = dma.general %s11_s8, 2048, %s13_s11, %s34_s12, %s35_s13, [#allocation4], %s36_s14, 0  }
   0x4   :  { %32 = dma.done.wait [#allocation2], 2048 }
   0x5   :  { %33 = vsyncadd [#allocation2], 4294965248 }
   0x6   :  { %22 = vsyncmov [#allocation2] }
   0x9   :  { %s23_s15 = vpop.sfrf %22 }
   0xa   :  { %p28_p0 = scmp.ne.s32.totalorder %s23_s15, 0 }
   0xc   :  { %27 = shalt.err (%p28_p0)  }

</bundles_post_ra>
